<compile_context>
chip_gen: v7x
topology: tpu7x:2x2x1
jax: 0.10.0
libtpu: 0.0.40
codegen_flags: <defaults>
</compile_context>

<pallas_src>
import functools
import math

import jax
import jax.numpy as jnp
from jax import lax
from jax.experimental import pallas as pl
from jax.experimental.pallas import tpu as pltpu


def _round_up(x, m):
    return ((x + m - 1) // m) * m


# ---------------------------------------------------------------------------
# Per-layer tiled kernels: y = x @ W^T + b, optional ReLU.
#   x: (M, K), W: (N, K) (PyTorch layout), b: (N,)
# ---------------------------------------------------------------------------
def _linear_kernel_acc(x_ref, w_ref, b_ref, o_ref, acc_ref, *,
                       activate_relu, compute_dtype):
    """Multi-step K reduction: float32 VMEM accumulator, epilogue at k==last."""
    k = pl.program_id(2)

    @pl.when(k == 0)
    def _():
        acc_ref[...] = jnp.zeros_like(acc_ref)

    x = x_ref[...]
    w = w_ref[...]
    if compute_dtype is not None:
        x = x.astype(compute_dtype)
        w = w.astype(compute_dtype)

    # Contract the shared last dim of both operands directly on the MXU.
    acc_ref[...] += lax.dot_general(
        x, w,
        dimension_numbers=(((1,), (1,)), ((), ())),
        preferred_element_type=jnp.float32)

    @pl.when(k == pl.num_programs(2) - 1)
    def _():
        y = acc_ref[...] + b_ref[...]
        if activate_relu:
            y = jnp.maximum(y, 0.0)
        o_ref[...] = y.astype(o_ref.dtype)


def _linear_kernel_single_k(x_ref, w_ref, b_ref, o_ref, *,
                            activate_relu, compute_dtype):
    """K fits in one tile: no scratch accumulator round-trip."""
    x = x_ref[...]
    w = w_ref[...]
    if compute_dtype is not None:
        x = x.astype(compute_dtype)
        w = w.astype(compute_dtype)
    y = lax.dot_general(
        x, w,
        dimension_numbers=(((1,), (1,)), ((), ())),
        preferred_element_type=jnp.float32)
    y = y + b_ref[...]
    if activate_relu:
        y = jnp.maximum(y, 0.0)
    o_ref[...] = y.astype(o_ref.dtype)


def sonnet_linear(x, w, b, activate_relu, *, tm=256, tn=256, tk=512,
                  compute_dtype=None):
    """Single SonnetLinear layer via an M/N/K-tiled Pallas matmul kernel."""
    m, k = x.shape
    n = w.shape[0]

    # Shrink tiles to the (aligned) problem size when the problem is small.
    tm = min(tm, _round_up(m, 8))      # sublane quantum
    tn = min(tn, _round_up(n, 128))    # lane-dense output tile
    tk = min(tk, _round_up(k, 128))

    m_pad = _round_up(m, tm)
    n_pad = _round_up(n, tn)
    k_pad = _round_up(k, tk)

    x_p = jnp.pad(x, ((0, m_pad - m), (0, k_pad - k)))
    w_p = jnp.pad(w, ((0, n_pad - n), (0, k_pad - k)))
    b_p = jnp.pad(b.reshape(1, n), ((0, 0), (0, n_pad - n)))

    grid = (m_pad // tm, n_pad // tn, k_pad // tk)
    single_k = grid[2] == 1
    itemsize = jnp.dtype(x.dtype).itemsize

    if single_k:
        kernel = functools.partial(
            _linear_kernel_single_k,
            activate_relu=activate_relu, compute_dtype=compute_dtype)
        scratch_shapes = []
    else:
        kernel = functools.partial(
            _linear_kernel_acc,
            activate_relu=activate_relu, compute_dtype=compute_dtype)
        scratch_shapes = [pltpu.VMEM((tm, tn), jnp.float32)]

    out = pl.pallas_call(
        kernel,
        out_shape=jax.ShapeDtypeStruct((m_pad, n_pad), x.dtype),
        grid_spec=pltpu.PrefetchScalarGridSpec(
            num_scalar_prefetch=0,
            grid=grid,
            in_specs=[
                pl.BlockSpec((tm, tk), lambda i, j, kk: (i, kk)),
                pl.BlockSpec((tn, tk), lambda i, j, kk: (j, kk)),
                pl.BlockSpec((1, tn), lambda i, j, kk: (0, j)),
            ],
            out_specs=pl.BlockSpec((tm, tn), lambda i, j, kk: (i, j)),
            scratch_shapes=scratch_shapes,
        ),
        compiler_params=pltpu.CompilerParams(
            dimension_semantics=("parallel", "parallel", "arbitrary")),
        cost_estimate=pl.CostEstimate(
            flops=2 * m_pad * n_pad * k_pad,
            transcendentals=0,
            bytes_accessed=itemsize * (m_pad * k_pad + n_pad * k_pad
                                       + n_pad + m_pad * n_pad)),
    )(x_p, w_p, b_p)
    return out[:m, :n]


# ---------------------------------------------------------------------------
# Fused MLP kernel (small nets): all layer weights resident in VMEM, the layer
# loop runs inside one pallas_call, activations never leave VMEM. Batch tiles
# are the only grid axis ("parallel" -> megacore sharding on v7x).
# ---------------------------------------------------------------------------
def _fused_mlp_kernel(x_ref, w_ref, b_ref, o_ref, *, relu_flags):
    h = x_ref[...].astype(jnp.float32)
    for l in range(len(relu_flags)):
        h = lax.dot_general(
            h, w_ref[l],
            dimension_numbers=(((1,), (1,)), ((), ())),
            preferred_element_type=jnp.float32)
        h = h + b_ref[l:l + 1, :]
        if relu_flags[l]:
            h = jnp.maximum(h, 0.0)
    o_ref[...] = h.astype(o_ref.dtype)


def _mlp_forward_fused(params, x, activate_final, *, tm=256):
    m, in_size = x.shape
    sizes = [in_size] + [w.shape[0] for w, _ in params]
    d = _round_up(max(sizes), 128)
    num_layers = len(params)

    tm = min(tm, _round_up(m, 8))
    m_pad = _round_up(m, tm)

    # Zero padding keeps semantics exact: padded columns stay exactly zero
    # through every layer (zero weights, zero bias, relu(0)=0).
    x_p = jnp.pad(x, ((0, m_pad - m), (0, d - in_size)))
    w_stack = jnp.stack(
        [jnp.pad(w, ((0, d - w.shape[0]), (0, d - w.shape[1])))
         for w, _ in params])
    b_stack = jnp.stack([jnp.pad(b, (0, d - b.shape[0])) for _, b in params])

    relu_flags = tuple(
        (i < num_layers - 1) or activate_final for i in range(num_layers))

    kernel = functools.partial(_fused_mlp_kernel, relu_flags=relu_flags)
    out = pl.pallas_call(
        kernel,
        out_shape=jax.ShapeDtypeStruct((m_pad, d), x.dtype),
        grid_spec=pltpu.PrefetchScalarGridSpec(
            num_scalar_prefetch=0,
            grid=(m_pad // tm,),
            in_specs=[
                pl.BlockSpec((tm, d), lambda i: (i, 0)),
                # Constant block index -> weights/bias loaded once, stay resident.
                pl.BlockSpec((num_layers, d, d), lambda i: (0, 0, 0)),
                pl.BlockSpec((num_layers, d), lambda i: (0, 0)),
            ],
            out_specs=pl.BlockSpec((tm, d), lambda i: (i, 0)),
        ),
        compiler_params=pltpu.CompilerParams(
            dimension_semantics=("parallel",)),
    )(x_p, w_stack, b_stack)
    return out[:m, :sizes[-1]]


def mlp_forward(params, x, activate_final=False, *, fuse=None):
    """MLP of SonnetLinear layers. Fuses the whole stack into one pallas_call
    when the padded weights comfortably fit VMEM (safe on v7x's 64 MiB)."""
    m, in_size = x.shape
    sizes = [in_size] + [w.shape[0] for w, _ in params]
    d = _round_up(max(sizes), 128)
    resident_bytes = len(params) * d * d * 4 + len(params) * d * 4
    if fuse is None:
        fuse = resident_bytes <= 8 * 1024 * 1024
    if fuse:
        return _mlp_forward_fused(params, x, activate_final)

    n = len(params)
    out = x
    for i, (w, b) in enumerate(params):
        activate_relu = (i < n - 1) or activate_final
        out = sonnet_linear(out, w, b, activate_relu)
    return out


# ---------------------------------------------------------------------------
# Init + pure-JAX reference (matches SonnetLinear.__init__ / forward).
# ---------------------------------------------------------------------------
def init_mlp_params(key, input_size, hidden_sizes, output_size):
    sizes = [input_size] + list(hidden_sizes) + [output_size]
    params = []
    for i in range(len(sizes) - 1):
        in_size, out_size = sizes[i], sizes[i + 1]
        key, sub = jax.random.split(key)
        stddev = 1.0 / math.sqrt(in_size)
        w = stddev * jax.random.truncated_normal(
            sub, -2.0, 2.0, (out_size, in_size), dtype=jnp.float32)
        b = jnp.zeros((out_size,), dtype=jnp.float32)
        params.append((w, b))
    return params


def mlp_reference(params, x, activate_final=False):
    n = len(params)
    for i, (w, b) in enumerate(params):
        y = x @ w.T + b
        if (i < n - 1) or activate_final:
            y = jnp.maximum(y, 0.0)
        x = y
    return x


if __name__ == "__main__":
    key = jax.random.PRNGKey(0)
    k_params, k_x = jax.random.split(key)

    batch = 4
    input_size = 16
    hidden_sizes = [32, 32]
    output_size = 8

    params = init_mlp_params(k_params, input_size, hidden_sizes, output_size)
    x = jax.random.normal(k_x, (batch, input_size), dtype=jnp.float32)

    ref = mlp_reference(params, x, activate_final=False)

    # Fused path: one pallas_call for the whole MLP, weights resident in VMEM.
    out_fused = jax.block_until_ready(
        mlp_forward(params, x, activate_final=False, fuse=True))
    # Tiled per-layer path (grid + accumulator kernel).
    out_tiled = jax.block_until_ready(
        mlp_forward(params, x, activate_final=False, fuse=False))

    assert out_fused.shape == (batch, output_size)
    assert out_tiled.shape == (batch, output_size)
    assert jnp.allclose(out_fused, ref, atol=1e-4, rtol=1e-4)
    assert jnp.allclose(out_tiled, ref, atol=1e-4, rtol=1e-4)

    # Exercise a multi-tile grid (M, N, K all padded; 3 K reduction steps).
    ka, kb, kc = jax.random.split(jax.random.PRNGKey(1), 3)
    m2, k2, n2 = 32, 1088, 300
    x2 = jax.random.normal(ka, (m2, k2), dtype=jnp.float32)
    w2 = jax.random.normal(kb, (n2, k2), dtype=jnp.float32) * 0.02
    b2 = jax.random.normal(kc, (n2,), dtype=jnp.float32)
    y2_ref = jnp.maximum(x2 @ w2.T + b2, 0.0)

    y2 = jax.block_until_ready(sonnet_linear(x2, w2, b2, activate_relu=True))
    assert jnp.allclose(y2, y2_ref, atol=1e-3, rtol=1e-3)

    # Single-K fast path (no scratch accumulator), final layer without ReLU.
    y3_ref = x2[:, :512] @ w2[:, :512].T + b2
    y3 = jax.block_until_ready(
        sonnet_linear(x2[:, :512], w2[:, :512], b2, activate_relu=False))
    assert jnp.allclose(y3, y3_ref, atol=1e-3, rtol=1e-3)

    # bf16 matmul inputs with f32 accumulation (roofline win on all gens).
    y2_bf16 = jax.block_until_ready(
        sonnet_linear(x2, w2, b2, activate_relu=True,
                      compute_dtype=jnp.bfloat16))
    assert jnp.allclose(y2_bf16, y2_ref, atol=5e-2, rtol=5e-2)

    print("KERNEL_OK")
</pallas_src>

<mosaic_0001>
module attributes {stable_mosaic.version = 11 : i64} {
  func.func @_fused_mlp_kernel(%arg0: i32, %arg1: memref<8x128xf32, #tpu.memory_space<vmem>>, %arg2: memref<3x128x128xf32, #tpu.memory_space<vmem>>, %arg3: memref<3x128xf32, #tpu.memory_space<vmem>>, %arg4: memref<8x128xf32, #tpu.memory_space<vmem>>) attributes {dimension_semantics = [#tpu.dimension_semantics<parallel>], iteration_bounds = array<i64: 1>, scalar_prefetch = 0 : i64, scratch_operands = 0 : i64, tpu.core_type = #tpu.core_type<tc>, window_params = [{transform_indices = @transform_0, window_bounds = array<i64: 8, 128>}, {pipeline_mode = #tpu.pipeline_mode<synchronous>, transform_indices = @transform_1, window_bounds = array<i64: 3, 128, 128>}, {pipeline_mode = #tpu.pipeline_mode<synchronous>, transform_indices = @transform_2, window_bounds = array<i64: 3, 128>}, {transform_indices = @transform_3, window_bounds = array<i64: 8, 128>}]} {
    %c0 = arith.constant 0 : index
    %c0_0 = arith.constant 0 : index
    %0 = vector.load %arg1[%c0, %c0_0] : memref<8x128xf32, #tpu.memory_space<vmem>>, vector<8x128xf32>
    %c0_1 = arith.constant 0 : index
    %c0_2 = arith.constant 0 : index
    %c0_3 = arith.constant 0 : index
    %1 = vector.load %arg2[%c0_1, %c0_2, %c0_3] : memref<3x128x128xf32, #tpu.memory_space<vmem>>, vector<1x128x128xf32>
    %2 = vector.shape_cast %1 : vector<1x128x128xf32> to vector<128x128xf32>
    %cst = arith.constant dense<0.000000e+00> : vector<8x128xf32>
    %3 = tpu.matmul %0, %2, %cst {dimension_numbers = #tpu.dot_dimension_numbers<[1], [1], [0], [0], [0, 0, 1, 0], [], []>} : vector<8x128xf32>, vector<128x128xf32>, vector<8x128xf32> -> vector<8x128xf32>
    %c0_4 = arith.constant 0 : index
    %c0_5 = arith.constant 0 : index
    %4 = vector.load %arg3[%c0_4, %c0_5] : memref<3x128xf32, #tpu.memory_space<vmem>>, vector<1x128xf32>
    %5 = vector.broadcast %4 : vector<1x128xf32> to vector<8x128xf32>
    %6 = arith.addf %3, %5 : vector<8x128xf32>
    %cst_6 = arith.constant 0.000000e+00 : f32
    %7 = vector.broadcast %cst_6 : f32 to vector<8x128xf32>
    %8 = arith.maximumf %6, %7 : vector<8x128xf32>
    %c1 = arith.constant 1 : index
    %c0_7 = arith.constant 0 : index
    %c0_8 = arith.constant 0 : index
    %9 = vector.load %arg2[%c1, %c0_7, %c0_8] : memref<3x128x128xf32, #tpu.memory_space<vmem>>, vector<1x128x128xf32>
    %10 = vector.shape_cast %9 : vector<1x128x128xf32> to vector<128x128xf32>
    %cst_9 = arith.constant dense<0.000000e+00> : vector<8x128xf32>
    %11 = tpu.matmul %8, %10, %cst_9 {dimension_numbers = #tpu.dot_dimension_numbers<[1], [1], [0], [0], [0, 0, 1, 0], [], []>} : vector<8x128xf32>, vector<128x128xf32>, vector<8x128xf32> -> vector<8x128xf32>
    %c1_10 = arith.constant 1 : index
    %c0_11 = arith.constant 0 : index
    %12 = vector.load %arg3[%c1_10, %c0_11] : memref<3x128xf32, #tpu.memory_space<vmem>>, vector<1x128xf32>
    %13 = vector.broadcast %12 : vector<1x128xf32> to vector<8x128xf32>
    %14 = arith.addf %11, %13 : vector<8x128xf32>
    %cst_12 = arith.constant 0.000000e+00 : f32
    %15 = vector.broadcast %cst_12 : f32 to vector<8x128xf32>
    %16 = arith.maximumf %14, %15 : vector<8x128xf32>
    %c2 = arith.constant 2 : index
    %c0_13 = arith.constant 0 : index
    %c0_14 = arith.constant 0 : index
    %17 = vector.load %arg2[%c2, %c0_13, %c0_14] : memref<3x128x128xf32, #tpu.memory_space<vmem>>, vector<1x128x128xf32>
    %18 = vector.shape_cast %17 : vector<1x128x128xf32> to vector<128x128xf32>
    %cst_15 = arith.constant dense<0.000000e+00> : vector<8x128xf32>
    %19 = tpu.matmul %16, %18, %cst_15 {dimension_numbers = #tpu.dot_dimension_numbers<[1], [1], [0], [0], [0, 0, 1, 0], [], []>} : vector<8x128xf32>, vector<128x128xf32>, vector<8x128xf32> -> vector<8x128xf32>
    %c2_16 = arith.constant 2 : index
    %c0_17 = arith.constant 0 : index
    %20 = vector.load %arg3[%c2_16, %c0_17] : memref<3x128xf32, #tpu.memory_space<vmem>>, vector<1x128xf32>
    %21 = vector.broadcast %20 : vector<1x128xf32> to vector<8x128xf32>
    %22 = arith.addf %19, %21 : vector<8x128xf32>
    %c0_18 = arith.constant 0 : index
    %c0_19 = arith.constant 0 : index
    %23 = vector.load %arg4[%c0_18, %c0_19] : memref<8x128xf32, #tpu.memory_space<vmem>>, vector<8x128xf32>
    tpu.vector_store %arg4[%c0_18, %c0_19], %22 {strides = array<i32>} : memref<8x128xf32, #tpu.memory_space<vmem>>, vector<8x128xf32>,
    return
  }
  func.func @transform_0(%arg0: i32) -> (i32, i32) {
    %c0_i32 = arith.constant 0 : i32
    %c0_i32_0 = arith.constant 0 : i32
    return %arg0, %c0_i32 : i32, i32
  }
  func.func @transform_1(%arg0: i32) -> (i32, i32, i32) {
    %c0_i32 = arith.constant 0 : i32
    %c0_i32_0 = arith.constant 0 : i32
    %c0_i32_1 = arith.constant 0 : i32
    %c0_i32_2 = arith.constant 0 : i32
    return %c0_i32, %c0_i32_0, %c0_i32_1 : i32, i32, i32
  }
  func.func @transform_2(%arg0: i32) -> (i32, i32) {
    %c0_i32 = arith.constant 0 : i32
    %c0_i32_0 = arith.constant 0 : i32
    %c0_i32_1 = arith.constant 0 : i32
    return %c0_i32, %c0_i32_0 : i32, i32
  }
  func.func @transform_3(%arg0: i32) -> (i32, i32) {
    %c0_i32 = arith.constant 0 : i32
    %c0_i32_0 = arith.constant 0 : i32
    return %arg0, %c0_i32 : i32, i32
  }
}

</mosaic_0001>

<bundles_post_ra>
// kernel: tpu_custom_call.1
= control target key start
LH: loop header
LB: loop body
LE: loop exit
PB: predicated region body
PF: predicated region fallthrough
CT: control target
= control target key end

     0   :  { %8 = vsyncpa [#allocation3], 0  ;;  %s757_s0 = inlined_call_operand.hbm [shape: f32[8,128], index: 0, kind: input, shape index: {}]   ;;  %s758_s1 = inlined_call_operand.hbm [shape: f32[3,128,128], index: 1, kind: input, shape index: {}]   ;;  %s759_s2 = inlined_call_operand.vmem [shape: f32[3,128], index: 2, kind: input, shape index: {}]   ;;  %s760_s3 = inlined_call_operand.hbm [shape: f32[8,128], index: 3, kind: output, shape index: {}]  }
   0x1   :  { %9 = vsyncpa [#allocation6], 0 }
   0x2   :  { %10 = vsyncpa [#allocation4], 0  ;;  %s647_s12 = smov [#allocation2]   ;;  %s648_s14 = smov [#allocation5]  }
   0x3   :  { %s17_s13 = sshll.u32 %s647_s12, 4  ;;  %s26_s15 = sshll.u32 %s648_s14, 4  ;;  %s18_s13 = int_to_ptr.vmem [resolvable:$true] %s17_s13  ;;  %s675_s15 = int_to_ptr.vmem [resolvable:$true] %s26_s15 }
   0x4   :  { %s575_s18 = scalar_lea.hbm %s757_s0, 128 }
   0x5   :  { %p576_p0 = scmp.ne.s32.totalorder %s757_s0, %s575_s18  ;;  %p579_p1 = scmp.lt.u32.totalorder %s575_s18, %s757_s0 }
   0x7   :  { %p581_p2 = pnand %p579_p1, %p576_p0 }
   0x9   :  { %584 = shalt.err (!%p581_p2)
}
   0xa   :  { %s585_s23 = scalar_lea.vmem %s18_s13, 128  ;;  %p590_p4 = scmp.lt.s32.totalorder %s18_s13, %s18_s13 }
   0xb   :  { %p586_p3 = scmp.ne.s32.totalorder %s18_s13, %s585_s23  ;;  %p591_p5 = scmp.lt.s32.totalorder %s585_s23, %s585_s23 }
   0xd   :  { %p592_p6 = por %p591_p5, %p590_p4 }
   0xf   :  { %p593_p7 = pnand %p592_p6, %p586_p3 }
  0x11   :  { %596 = shalt.err (!%p593_p7)
}
  0x12   :  { %20 = dma.hbm_to_vmem [thread:$0]  %s757_s0, 128, %s18_s13, [#allocation3]  }
  0x13   :  { %s597_s28 = scalar_lea.hbm %s758_s1, 6144 }
  0x14   :  { %p598_p8 = scmp.ne.s32.totalorder %s758_s1, %s597_s28  ;;  %p601_p9 = scmp.lt.u32.totalorder %s597_s28, %s758_s1 }
  0x16   :  { %p603_p10 = pnand %p601_p9, %p598_p8 }
  0x18   :  { %606 = shalt.err (!%p603_p10)
}
  0x19   :  { %s607_s6 = scalar_lea.vmem %s675_s15, 6144  ;;  %p612_p12 = scmp.lt.s32.totalorder %s675_s15, %s675_s15 }
  0x1a   :  { %p608_p11 = scmp.ne.s32.totalorder %s675_s15, %s607_s6  ;;  %p613_p13 = scmp.lt.s32.totalorder %s607_s6, %s607_s6 }
  0x1c   :  { %p614_p0 = por %p613_p13, %p612_p12 }
  0x1e   :  { %p615_p1 = pnand %p614_p0, %p608_p11 }
  0x20   :  { %618 = shalt.err (!%p615_p1)
}
  0x21   :  { %s649_s0 = smov 128   ;;  %s650_s7 = smov 8  }
  0x22   :  { %32 = dma.hbm_to_vmem [thread:$0]  %s758_s1, 6144, %s675_s15, [#allocation6], %s649_s0, %s649_s0, %s650_s7  }
  0x23   :  { %641 = dma.done.wait [#allocation3], 128  }
  0x24   :  { %642 = vsyncadd [#allocation3], 4294967168 }
  0x25   :  { %643 = dma.done.wait [#allocation6], 6144  }
  0x26   :  { %644 = vsyncadd [#allocation6], 4294961152  ;;  %v651_v0 = vmov 0.0|0.0   ;;  %vm652_vm0 = vmmov 0   ;;  %v653_v1 = vmov 0.0   ;;  %v42_v2 = vld [vmem:[#allocation5] sm:$0xff] }
  0x27   :  { %495 = vmatprep.subr.bf16.mxu0 %v651_v0  ;;  %422 = vmatprep.mubr.msk.f32.mxu0 %vm652_vm0, %v653_v1  ;;  %v43_v3 = vld [vmem:[#allocation5 + $0x8] sm:$0xff]  ;;  %v44_v5 = vld [vmem:[#allocation5 + $0x10] sm:$0xff]  ;;  %v45_v6 = vld [vmem:[#allocation5 + $0x18] sm:$0xff]  ;;  %s654_s15 = smov [#allocation7]  }
  0x28   :  { %519 = vmatprep.subr.bf16.mxu1 %v651_v0  ;;  %457 = vmatprep.mubr.msk.f32.mxu1 %vm652_vm0, %v653_v1  ;;  %v496_v4 = vpack.c.bf16 %v43_v3, %v42_v2  ;;  %v135_v7 = vld [vmem:[#allocation5 + $0x80] sm:$0xff]  ;;  %v136_v8 = vld [vmem:[#allocation5 + $0x88] sm:$0xff]  ;;  %v499_v9 = vpack.c.bf16 %v45_v6, %v44_v5  ;;  %v137_v11 = vld [vmem:[#allocation5 + $0x90] sm:$0xff]  ;;  %s326_s16 = sshll.u32 %s654_s15, 4  ;;  %s327_s16 = int_to_ptr.vmem [resolvable:$true] %s326_s16 }
  0x29   :  { %v520_v10 = vpack.c.bf16 %v136_v8, %v135_v7  ;;  %v138_v12 = vld [vmem:[#allocation5 + $0x98] sm:$0xff]  ;;  %v46_v13 = vld [vmem:[#allocation5 + $0x20] sm:$0xff]  ;;  %v47_v14 = vld [vmem:[#allocation5 + $0x28] sm:$0xff]  ;;  %s619_s17 = scalar_lea.vmem %s327_s16, 128  ;;  %p624_p3 = scmp.lt.s32.totalorder %s327_s16, %s327_s16 }
  0x2a   :  { %497 = vmatpush3.bf16.xpose.msra.mxu0 %v496_v4  ;;  %v523_v15 = vpack.c.bf16 %v138_v12, %v137_v11  ;;  %v502_v16 = vpack.c.bf16 %v47_v14, %v46_v13  ;;  %v139_v17 = vld [vmem:[#allocation5 + $0xa0] sm:$0xff]  ;;  %v140_v18 = vld [vmem:[#allocation5 + $0xa8] sm:$0xff]  ;;  %v48_v19 = vld [vmem:[#allocation5 + $0x30] sm:$0xff]  ;;  %p620_p2 = scmp.ne.s32.totalorder %s327_s16, %s619_s17  ;;  %p625_p4 = scmp.lt.s32.totalorder %s619_s17, %s619_s17 }
  0x2b   :  { %498 = vmatprep.subr.bf16.mxu0 %v651_v0  ;;  %521 = vmatpush3.bf16.xpose.msra.mxu1 %v520_v10  ;;  %v49_v20 = vld [vmem:[#allocation5 + $0x38] sm:$0xff]  ;;  %v526_v21 = vpack.c.bf16 %v140_v18, %v139_v17  ;;  %v141_v23 = vld [vmem:[#allocation5 + $0xb0] sm:$0xff]  ;;  %v50_v25 = vld [vmem:[#allocation5 + $0x40] sm:$0xff] }
  0x2c   :  { %522 = vmatprep.subr.bf16.mxu1 %v651_v0  ;;  %v505_v22 = vpack.c.bf16 %v49_v20, %v48_v19  ;;  %v142_v24 = vld [vmem:[#allocation5 + $0xb8] sm:$0xff]  ;;  %v51_v26 = vld [vmem:[#allocation5 + $0x48] sm:$0xff]  ;;  %v143_v29 = vld [vmem:[#allocation5 + $0xc0] sm:$0xff]  ;;  %p626_p5 = por %p625_p4, %p624_p3 }
  0x2d   :  { %v529_v27 = vpack.c.bf16 %v142_v24, %v141_v23  ;;  %v508_v28 = vpack.c.bf16 %v51_v26, %v50_v25  ;;  %v144_v30 = vld [vmem:[#allocation5 + $0xc8] sm:$0xff]  ;;  %v52_v31 = vld [vmem:[#allocation5 + $0x50] sm:$0xff]  ;;  %v53_v32 = vld [vmem:[#allocation5 + $0x58] sm:$0xff] }
  0x2e   :  { %v532_v33 = vpack.c.bf16 %v144_v30, %v143_v29  ;;  %v511_v34 = vpack.c.bf16 %v53_v32, %v52_v31  ;;  %v145_v35 = vld [vmem:[#allocation5 + $0xd0] sm:$0xff]  ;;  %v146_v36 = vld [vmem:[#allocation5 + $0xd8] sm:$0xff]  ;;  %v54_v37 = vld [vmem:[#allocation5 + $0x60] sm:$0xff]  ;;  %p627_p6 = pnand %p626_p5, %p620_p2 }
  0x2f   :  { %v55_v38 = vld [vmem:[#allocation5 + $0x68] sm:$0xff]  ;;  %v535_v39 = vpack.c.bf16 %v146_v36, %v145_v35  ;;  %v147_v41 = vld [vmem:[#allocation5 + $0xe0] sm:$0xff]  ;;  %v56_v43 = vld [vmem:[#allocation5 + $0x70] sm:$0xff] }
  0x30   :  { %v514_v40 = vpack.c.bf16 %v55_v38, %v54_v37  ;;  %v148_v42 = vld [vmem:[#allocation5 + $0xe8] sm:$0xff]  ;;  %v57_v44 = vld [vmem:[#allocation5 + $0x78] sm:$0xff]  ;;  %v149_v47 = vld [vmem:[#allocation5 + $0xf0] sm:$0xff] }
  0x31   :  { %v538_v45 = vpack.c.bf16 %v148_v42, %v147_v41  ;;  %v517_v46 = vpack.c.bf16 %v57_v44, %v56_v43  ;;  %v150_v48 = vld [vmem:[#allocation5 + $0xf8] sm:$0xff]  ;;  %v228_v51 = vld [vmem:[#allocation5 + $0x100] sm:$0xff]  ;;  %v229_v52 = vld [vmem:[#allocation5 + $0x108] sm:$0xff] }
  0x32   :  { %500 = vmatpush3.bf16.xpose.msra.mxu0 %v499_v9  ;;  %v541_v49 = vpack.c.bf16 %v150_v48, %v149_v47  ;;  %v41_v50 = vld [vmem:[#allocation2] sm:$0xff]  ;;  %v544_v53 = vpack.c.bf16 %v229_v52, %v228_v51  ;;  %v230_v54 = vld [vmem:[#allocation5 + $0x110] sm:$0xff]  ;;  %v232_v57 = vld [vmem:[#allocation5 + $0x120] sm:$0xff] }
  0x33   :  { %501 = vmatprep.subr.bf16.mxu0 %v651_v0  ;;  %524 = vmatpush3.bf16.xpose.msra.mxu1 %v523_v15  ;;  %v231_v55 = vld [vmem:[#allocation5 + $0x118] sm:$0xff]  ;;  %v233_v58 = vld [vmem:[#allocation5 + $0x128] sm:$0xff]  ;;  %v234_v60 = vld [vmem:[#allocation5 + $0x130] sm:$0xff] }
  0x34   :  { %525 = vmatprep.subr.bf16.mxu1 %v651_v0  ;;  %v547_v56 = vpack.c.bf16 %v231_v55, %v230_v54  ;;  %v550_v59 = vpack.c.bf16 %v233_v58, %v232_v57  ;;  %v235_v61 = vld [vmem:[#allocation5 + $0x138] sm:$0xff]  ;;  %v236_v63 = vld [vmem:[#allocation5 + $0x140] sm:$0xff]  ;;  %v238_v3 = vld [vmem:[#allocation5 + $0x150] sm:$0xff] }
  0x35   :  { %v553_v62 = vpack.c.bf16 %v235_v61, %v234_v60  ;;  %v239_v4 = vld [vmem:[#allocation5 + $0x158] sm:$0xff]  ;;  %v240_v6 = vld [vmem:[#allocation5 + $0x160] sm:$0xff]  ;;  %v241_v7 = vld [vmem:[#allocation5 + $0x168] sm:$0xff] }
  0x36   :  { %v559_v5 = vpack.c.bf16 %v239_v4, %v238_v3  ;;  %v562_v8 = vpack.c.bf16 %v241_v7, %v240_v6  ;;  %v242_v9 = vld [vmem:[#allocation5 + $0x170] sm:$0xff]  ;;  %v243_v10 = vld [vmem:[#allocation5 + $0x178] sm:$0xff] }
  0x37   :  { %v565_v11 = vpack.c.bf16 %v243_v10, %v242_v9  ;;  %v336_v12 = vld [vmem:[%s759_s2] ss:$0 sm:$0xff]  ;;  %v337_v17 = vld [vmem:[%s759_s2 + $0x1] ss:$0 sm:$0xff] }
  0x3a   :  { %503 = vmatpush3.bf16.xpose.msra.mxu0 %v502_v16 }
  0x3b   :  { %504 = vmatprep.subr.bf16.mxu0 %v651_v0  ;;  %527 = vmatpush3.bf16.xpose.msra.mxu1 %v526_v21  ;;  %v338_v21 = vld [vmem:[%s759_s2 + $0x2] ss:$0 sm:$0xff] }
  0x3c   :  { %528 = vmatprep.subr.bf16.mxu1 %v651_v0 }
  0x42   :  { %506 = vmatpush3.bf16.xpose.msra.mxu0 %v505_v22 }
  0x43   :  { %507 = vmatprep.subr.bf16.mxu0 %v651_v0  ;;  %530 = vmatpush3.bf16.xpose.msra.mxu1 %v529_v27 }
  0x44   :  { %531 = vmatprep.subr.bf16.mxu1 %v651_v0 }
  0x4a   :  { %509 = vmatpush3.bf16.xpose.msra.mxu0 %v508_v28 }
  0x4b   :  { %510 = vmatprep.subr.bf16.mxu0 %v651_v0  ;;  %533 = vmatpush3.bf16.xpose.msra.mxu1 %v532_v33 }
  0x4c   :  { %534 = vmatprep.subr.bf16.mxu1 %v651_v0 }
  0x52   :  { %512 = vmatpush3.bf16.xpose.msra.mxu0 %v511_v34 }
  0x53   :  { %513 = vmatprep.subr.bf16.mxu0 %v651_v0  ;;  %536 = vmatpush3.bf16.xpose.msra.mxu1 %v535_v39 }
  0x54   :  { %537 = vmatprep.subr.bf16.mxu1 %v651_v0 }
  0x5a   :  { %515 = vmatpush3.bf16.xpose.msra.mxu0 %v514_v40 }
  0x5b   :  { %516 = vmatprep.subr.bf16.mxu0 %v651_v0  ;;  %539 = vmatpush3.bf16.xpose.msra.mxu1 %v538_v45 }
  0x5c   :  { %540 = vmatprep.subr.bf16.mxu1 %v651_v0 }
  0x62   :  { %518 = vmatpush3.bf16.xpose.msra.mxu0 %v517_v46 }
  0x63   :  { %543 = vmatprep.subr.bf16.mxu0 %v651_v0  ;;  %542 = vmatpush3.bf16.xpose.msra.mxu1 %v541_v49 }
  0x69   :  { %423 = vmatmul.mubr.f32.vlgmr.msra.gmra.mrb[0].mxu0 %v41_v50 }
  0x6a   :  { %492 = vmatprep.mubr.msk.f32.mxu0 %vm652_vm0, %v653_v1  ;;  %545 = vmatpush3.bf16.xpose.msra.mxu0 %v544_v53  ;;  %v237_v1 = vld [vmem:[#allocation5 + $0x148] sm:$0xff] }
  0x6b   :  { %546 = vmatprep.subr.bf16.mxu0 %v651_v0  ;;  %v556_v2 = vpack.c.bf16 %v237_v1, %v236_v63 }
  0x72   :  { %548 = vmatpush3.bf16.xpose.msra.mxu0 %v547_v56 }
  0x73   :  { %549 = vmatprep.subr.bf16.mxu0 %v651_v0 }
  0x7a   :  { %551 = vmatpush3.bf16.xpose.msra.mxu0 %v550_v59 }
  0x7b   :  { %552 = vmatprep.subr.bf16.mxu0 %v651_v0 }
  0x82   :  { %554 = vmatpush3.bf16.xpose.msra.mxu0 %v553_v62 }
  0x83   :  { %555 = vmatprep.subr.bf16.mxu0 %v651_v0 }
  0x8a   :  { %557 = vmatpush3.bf16.xpose.msra.mxu0 %v556_v2 }
  0x8b   :  { %558 = vmatprep.subr.bf16.mxu0 %v651_v0 }
  0x92   :  { %560 = vmatpush3.bf16.xpose.msra.mxu0 %v559_v5 }
  0x93   :  { %561 = vmatprep.subr.bf16.mxu0 %v651_v0 }
  0x9a   :  { %563 = vmatpush3.bf16.xpose.msra.mxu0 %v562_v8 }
  0x9b   :  { %564 = vmatprep.subr.bf16.mxu0 %v651_v0 }
  0xa2   :  { %566 = vmatpush3.bf16.xpose.msra.mxu0 %v565_v11 }
 0x13c   :  { %v129_v13 = vpop.f32.mrb[0].mxu0 }
 0x13d   :  { %v130_v14 = vadd.f32 %v336_v12, %v129_v13  ;;  %v424_v15 = vpop.f32.mrb[1].mxu0 }
 0x13f   :  { %v133_v16 = vmax.f32 %v130_v14, 0.0 }
 0x141   :  { %458 = vmatmul.mubr.f32.vlgmr.msra.gmra.mrb[0].mxu1 %v133_v16 }
 0x214   :  { %v222_v18 = vpop.f32.mrb[0].mxu1 }
 0x215   :  { %v223_v19 = vadd.f32 %v337_v17, %v222_v18  ;;  %v459_v0 = vpop.f32.mrb[1].mxu1 }
 0x217   :  { %v226_v20 = vmax.f32 %v223_v19, 0.0 }
 0x219   :  { %493 = vmatmul.mubr.f32.vlgmr.msra.gmra.mrb[2].mxu0 %v226_v20 }
 0x2ec   :  { %v315_v22 = vpop.f32.mrb[2].mxu0 }
 0x2ed   :  { %v316_v23 = vadd.f32 %v338_v21, %v315_v22  ;;  %v494_v24 = vpop.f32.mrb[3].mxu0 }
 0x2ef   :  { %319 = vst [vmem:[#allocation7] sm:$0xff] %v316_v23 }
 0x2f0   :  { %630 = shalt.err (!%p627_p6)
}
 0x2f1   :  { %s631_s20 = scalar_lea.hbm %s760_s3, 128 }
 0x2f2   :  { %p632_p7 = scmp.ne.s32.totalorder %s760_s3, %s631_s20  ;;  %p635_p8 = scmp.lt.u32.totalorder %s631_s20, %s760_s3 }
 0x2f4   :  { %p637_p9 = pnand %p635_p8, %p632_p7 }
 0x2f6   :  { %640 = shalt.err (!%p637_p9)
}
 0x2f7   :  { %329 = dma.vmem_to_hbm [thread:$0]  %s327_s16, 128, %s760_s3, [#allocation4]  }
 0x2f8   :  { %645 = dma.done.wait [#allocation4], 128  }
 0x2f9   :  { %646 = vsyncadd [#allocation4], 4294967168 }
 0x2fa   :  { %333 = vsyncpa [#allocation3], 1 }
 0x2fb   :  { %334 = vsyncpa [#allocation6], 1 }
 0x2fc   :  { %335 = vsyncpa [#allocation4], 1 }

</bundles_post_ra>
